<compile_context>
chip_gen: v5e
topology: v5e:2x2
jax: 0.10.0
libtpu: 0.0.40
codegen_flags: <defaults>
</compile_context>

<pallas_src>
import jax
import jax.numpy as jnp
from jax import lax
from jax.experimental import pallas as pl
from jax.experimental.pallas import tpu as pltpu


def _blur_kernel(x_ref, o_ref):
    # x_ref block: (TB, H, W) -- TB independent channel-images.
    x = x_ref[...].astype(jnp.float32)
    tb, h, w = x.shape

    # Horizontal pass: (1, 2, 1) with zero boundary along W (lane axis).
    zc = jnp.zeros((tb, h, 1), jnp.float32)
    left = jnp.concatenate([zc, x[:, :, : w - 1]], axis=2)   # x[.., j-1]
    right = jnp.concatenate([x[:, :, 1:], zc], axis=2)       # x[.., j+1]
    hpass = left + 2.0 * x + right

    # Vertical pass: (1, 2, 1) with zero boundary along H (sublane axis).
    zr = jnp.zeros((tb, 1, w), jnp.float32)
    up = jnp.concatenate([zr, hpass[:, : h - 1, :]], axis=1)  # hpass[i-1, ..]
    down = jnp.concatenate([hpass[:, 1:, :], zr], axis=1)     # hpass[i+1, ..]
    out = (up + 2.0 * hpass + down) * (1.0 / 16.0)

    o_ref[...] = out.astype(o_ref.dtype)


def _pick_block_images(nc, h, w):
    # Target ~2 MiB of f32 per block; with in+out and double-buffering that is
    # well under the default scoped VMEM on every generation (v7x included).
    per_img_f32 = h * w * 4
    tb = max(1, (2 * 1024 * 1024) // per_img_f32)
    return int(min(nc, tb))


def blur(x):
    """x: (N, C, H, W). Returns depthwise 3x3 binomial blur, same shape/dtype."""
    N, C, H, W = x.shape
    NC = N * C
    x3 = x.reshape(NC, H, W)

    TB = _pick_block_images(NC, H, W)
    pad = (-NC) % TB
    if pad:
        # Zeros blur to zeros; padded rows are sliced off below.
        x3 = jnp.pad(x3, ((0, pad), (0, 0), (0, 0)))
    NCp = NC + pad

    out = pl.pallas_call(
        _blur_kernel,
        out_shape=jax.ShapeDtypeStruct((NCp, H, W), x.dtype),
        grid_spec=pltpu.PrefetchScalarGridSpec(
            num_scalar_prefetch=0,
            grid=(NCp // TB,),
            in_specs=[pl.BlockSpec((TB, H, W), lambda i: (i, 0, 0))],
            out_specs=pl.BlockSpec((TB, H, W), lambda i: (i, 0, 0)),
        ),
        compiler_params=pltpu.CompilerParams(
            dimension_semantics=("parallel",),
        ),
    )(x3)

    if pad:
        out = out[:NC]
    return out.reshape(N, C, H, W)


def _blur_ref(x):
    """Pure-JAX reference mirroring the PyTorch module (depthwise conv2d)."""
    C = x.shape[1]
    w = jnp.array([[1.0, 2.0, 1.0], [2.0, 4.0, 2.0], [1.0, 2.0, 1.0]],
                  dtype=jnp.float32) / 16.0
    kern = jnp.broadcast_to(w[None, None, :, :], (C, 1, 3, 3))
    out = lax.conv_general_dilated(
        x.astype(jnp.float32), kern,
        window_strides=(1, 1),
        padding=((1, 1), (1, 1)),
        dimension_numbers=("NCHW", "OIHW", "NCHW"),
        feature_group_count=C,
    )
    return out.astype(x.dtype)


if __name__ == "__main__":
    key = jax.random.PRNGKey(0)
    x = jax.random.normal(key, (2, 4, 16, 16), dtype=jnp.float32)

    out = blur(x)
    out = jax.block_until_ready(out)

    ref = _blur_ref(x)
    assert out.shape == x.shape and out.dtype == x.dtype
    assert jnp.allclose(out, ref, atol=1e-5, rtol=1e-5)

    print("KERNEL_OK")
</pallas_src>

<mosaic_0001>
module attributes {stable_mosaic.version = 11 : i64} {
  func.func @_blur_kernel(%arg0: i32, %arg1: memref<8x16x16xf32, #tpu.memory_space<vmem>>, %arg2: memref<8x16x16xf32, #tpu.memory_space<vmem>>) attributes {dimension_semantics = [#tpu.dimension_semantics<parallel>], iteration_bounds = array<i64: 1>, scalar_prefetch = 0 : i64, scratch_operands = 0 : i64, tpu.core_type = #tpu.core_type<tc>, window_params = [{transform_indices = @transform_0, window_bounds = array<i64: 8, 16, 16>}, {transform_indices = @transform_1, window_bounds = array<i64: 8, 16, 16>}]} {
    %c0 = arith.constant 0 : index
    %c0_0 = arith.constant 0 : index
    %c0_1 = arith.constant 0 : index
    %0 = vector.load %arg1[%c0, %c0_0, %c0_1] : memref<8x16x16xf32, #tpu.memory_space<vmem>>, vector<8x16x16xf32>
    %cst = arith.constant 0.000000e+00 : f32
    %1 = vector.broadcast %cst : f32 to vector<8x16x1xf32>
    %2 = vector.extract_strided_slice %0 {offsets = [0, 0, 0], sizes = [8, 16, 15], strides = [1, 1, 1]} : vector<8x16x16xf32> to vector<8x16x15xf32>
    %3 = tpu.concatenate %1, %2 in 2 : vector<8x16x1xf32>, vector<8x16x15xf32> -> vector<8x16x16xf32>
    %4 = vector.extract_strided_slice %0 {offsets = [0, 0, 1], sizes = [8, 16, 15], strides = [1, 1, 1]} : vector<8x16x16xf32> to vector<8x16x15xf32>
    %5 = tpu.concatenate %4, %1 in 2 : vector<8x16x15xf32>, vector<8x16x1xf32> -> vector<8x16x16xf32>
    %cst_2 = arith.constant 2.000000e+00 : f32
    %6 = vector.broadcast %cst_2 : f32 to vector<8x16x16xf32>
    %7 = arith.mulf %6, %0 : vector<8x16x16xf32>
    %8 = arith.addf %3, %7 : vector<8x16x16xf32>
    %9 = arith.addf %8, %5 : vector<8x16x16xf32>
    %cst_3 = arith.constant 0.000000e+00 : f32
    %10 = vector.broadcast %cst_3 : f32 to vector<8x1x16xf32>
    %11 = vector.extract_strided_slice %9 {offsets = [0, 0, 0], sizes = [8, 15, 16], strides = [1, 1, 1]} : vector<8x16x16xf32> to vector<8x15x16xf32>
    %12 = tpu.concatenate %10, %11 in 1 : vector<8x1x16xf32>, vector<8x15x16xf32> -> vector<8x16x16xf32>
    %13 = vector.extract_strided_slice %9 {offsets = [0, 1, 0], sizes = [8, 15, 16], strides = [1, 1, 1]} : vector<8x16x16xf32> to vector<8x15x16xf32>
    %14 = tpu.concatenate %13, %10 in 1 : vector<8x15x16xf32>, vector<8x1x16xf32> -> vector<8x16x16xf32>
    %cst_4 = arith.constant 2.000000e+00 : f32
    %15 = vector.broadcast %cst_4 : f32 to vector<8x16x16xf32>
    %16 = arith.mulf %15, %9 : vector<8x16x16xf32>
    %17 = arith.addf %12, %16 : vector<8x16x16xf32>
    %18 = arith.addf %17, %14 : vector<8x16x16xf32>
    %cst_5 = arith.constant 6.250000e-02 : f32
    %19 = vector.broadcast %cst_5 : f32 to vector<8x16x16xf32>
    %20 = arith.mulf %18, %19 : vector<8x16x16xf32>
    %c0_6 = arith.constant 0 : index
    %c0_7 = arith.constant 0 : index
    %c0_8 = arith.constant 0 : index
    %21 = vector.load %arg2[%c0_6, %c0_7, %c0_8] : memref<8x16x16xf32, #tpu.memory_space<vmem>>, vector<8x16x16xf32>
    tpu.vector_store %arg2[%c0_6, %c0_7, %c0_8], %20 {strides = array<i32>} : memref<8x16x16xf32, #tpu.memory_space<vmem>>, vector<8x16x16xf32>,
    return
  }
  func.func @transform_0(%arg0: i32) -> (i32, i32, i32) {
    %c0_i32 = arith.constant 0 : i32
    %c0_i32_0 = arith.constant 0 : i32
    %c0_i32_1 = arith.constant 0 : i32
    return %arg0, %c0_i32, %c0_i32_0 : i32, i32, i32
  }
  func.func @transform_1(%arg0: i32) -> (i32, i32, i32) {
    %c0_i32 = arith.constant 0 : i32
    %c0_i32_0 = arith.constant 0 : i32
    %c0_i32_1 = arith.constant 0 : i32
    return %arg0, %c0_i32, %c0_i32_0 : i32, i32, i32
  }
}

</mosaic_0001>

<bundles_post_ra>
// kernel: tpu_custom_call.1
= control target key start
LH: loop header
LB: loop body
LE: loop exit
PB: predicated region body
PF: predicated region fallthrough
CT: control target
= control target key end

     0   :  { %6 = vsyncpa [#allocation3], 0  ;;  %s753_s0 = inlined_call_operand.hbm [shape: f32[8,16,16], index: 0, kind: input, shape index: {}]   ;;  %s754_s1 = inlined_call_operand.hbm [shape: f32[8,16,16], index: 1, kind: output, shape index: {}]  }
   0x1   :  { %7 = vsyncpa [#allocation4], 0  ;;  %s12_s8 = sshll.u32 %s753_s0, 4  ;;  %s507_s9 = smov [#allocation2]   ;;  %s13_s8 = int_to_ptr.hbm [resolvable:$true] %s12_s8 }
   0x2   :  { %s14_s10 = sshll.u32 %s507_s9, 4  ;;  %s508_s11 = smov 128   ;;  %s15_s10 = int_to_ptr.vmem [resolvable:$true] %s14_s10 }
   0x3   :  { %s509_s12 = smov 8  }
   0x4   :  { %20 = dma.hbm_to_vmem [thread:$0]  %s13_s8, 2048, %s15_s10, [#allocation3], %s508_s11, %s508_s11, %s509_s12  }
   0x5   :  { %503 = dma.done.wait [#allocation3], 2048  }
   0x6   :  { %504 = vsyncadd [#allocation3], 4294965248  ;;  %v529_v0 = vld [vmem:[#allocation2 + $0x20] sm:$0xff]  ;;  %v531_v1 = vld [vmem:[#allocation2 + $0x10] sm:$0xff]  ;;  %s510_s13 = smov 1   ;;  %s511_s0 = smov 127  }
   0x7   :  { %v533_v2 = vld [vmem:[#allocation2] sm:$0xff]  ;;  %65 = vrot.lane.b32.xlu2 %v529_v0, %s510_s13  ;;  %61 = vrot.lane.b32.xlu1 %v531_v1, %s510_s13  ;;  %v541_v3 = vld [vmem:[#allocation2 + $0x28] sm:$0xff]  ;;  %v543_v4 = vld [vmem:[#allocation2 + $0x18] sm:$0xff]  ;;  %vm105_vm0 = vcmask 7168   ;;  %vm170_vm1 = vcmask 121856   ;;  %v191_v33 = vmul.f32 2.0, %v529_v0 }
   0x8   :  { %57 = vrot.lane.b32.xlu0 %v533_v2, %s510_s13  ;;  %v26_v5 = vld [vmem:[#allocation2 + $0x8] sm:$0xff]  ;;  %v33_v6 = vld [vmem:[#allocation2 + $0x40] sm:$0xff]  ;;  %v550_v7 = vld [vmem:[#allocation2 + $0x38] sm:$0xff]  ;;  %v192_v37 = vmul.f32 2.0, %v541_v3  ;;  %v187_v39 = vmul.f32 2.0, %v533_v2  ;;  %v189_v44 = vmul.f32 2.0, %v531_v1 }
   0x9   :  { %v552_v8 = vld [vmem:[#allocation2 + $0x30] sm:$0xff]  ;;  %v36_v9 = vld [vmem:[#allocation2 + $0x58] sm:$0xff]  ;;  %v561_v11 = vld [vmem:[#allocation2 + $0x48] sm:$0xff]  ;;  %v188_v32 = vmul.f32 2.0, %v26_v5  ;;  %v195_v38 = vmul.f32 2.0, %v33_v6  ;;  %v190_v46 = vmul.f32 2.0, %v543_v4 }
   0xa   :  { %v559_v10 = vld [vmem:[#allocation2 + $0x50] sm:$0xff]  ;;  %v568_v13 = vld [vmem:[#allocation2 + $0x68] sm:$0xff]  ;;  %v570_v14 = vld [vmem:[#allocation2 + $0x60] sm:$0xff]  ;;  %v611_v41 = vmul.f32 2.0, %v36_v9  ;;  %v194_v50 = vmul.f32 2.0, %v550_v7  ;;  %v622_v51 = vmul.f32 2.0, %v552_v8 }
   0xb   :  { %v39_v12 = vld [vmem:[#allocation2 + $0x70] sm:$0xff]  ;;  %v577_v15 = vld [vmem:[#allocation2 + $0x78] sm:$0xff]  ;;  %vm300_vm2 = vcmask 1046528   ;;  %v197_v56 = vmul.f32 2.0, %v559_v10  ;;  %v196_v58 = vmul.f32 2.0, %v561_v11  ;;  %vm251_vm3 = vcmask 1040384  }
   0xc   :  { %v616_v45 = vmul.f32 2.0, %v39_v12  ;;  %v200_v62 = vmul.f32 2.0, %v568_v13  ;;  %vm413_vm4 = vcmask 130048   ;;  %s512_s14 = smov [#allocation5]   ;;  %s436_s18 = sshll.u32 %s754_s1, 4  ;;  %s437_s18 = int_to_ptr.hbm [resolvable:$true] %s436_s18 }
   0xd   :  { %s434_s15 = sshll.u32 %s512_s14, 4  ;;  %s435_s15 = int_to_ptr.vmem [resolvable:$true] %s434_s15 }
   0xf   :  { %67 = vrot.lane.b32.xlu2 %v541_v3, %s510_s13  ;;  %63 = vrot.lane.b32.xlu1 %v543_v4, %s510_s13 }
  0x10   :  { %59 = vrot.lane.b32.xlu0 %v26_v5, %s510_s13 }
  0x17   :  { %73 = vrot.lane.b32.xlu2 %v33_v6, %s510_s13  ;;  %71 = vrot.lane.b32.xlu1 %v550_v7, %s510_s13 }
  0x18   :  { %69 = vrot.lane.b32.xlu0 %v552_v8, %s510_s13 }
  0x1f   :  { %79 = vrot.lane.b32.xlu2 %v36_v9, %s510_s13  ;;  %77 = vrot.lane.b32.xlu1 %v559_v10, %s510_s13 }
  0x20   :  { %75 = vrot.lane.b32.xlu0 %v561_v11, %s510_s13 }
  0x27   :  { %85 = vrot.lane.b32.xlu2 %v39_v12, %s510_s13  ;;  %83 = vrot.lane.b32.xlu1 %v568_v13, %s510_s13 }
  0x28   :  { %81 = vrot.lane.b32.xlu0 %v570_v14, %s510_s13 }
  0x2f   :  { %124 = vrot.lane.b32.xlu2 %v26_v5, %s511_s0  ;;  %122 = vrot.lane.b32.xlu1 %v533_v2, %s511_s0 }
  0x30   :  { %87 = vrot.lane.b32.xlu0 %v577_v15, %s510_s13 }
  0x37   :  { %130 = vrot.lane.b32.xlu2 %v529_v0, %s511_s0  ;;  %128 = vrot.lane.b32.xlu1 %v543_v4, %s511_s0 }
  0x38   :  { %126 = vrot.lane.b32.xlu0 %v531_v1, %s511_s0 }
  0x3f   :  { %136 = vrot.lane.b32.xlu2 %v550_v7, %s511_s0  ;;  %134 = vrot.lane.b32.xlu1 %v552_v8, %s511_s0 }
  0x40   :  { %132 = vrot.lane.b32.xlu0 %v541_v3, %s511_s0 }
  0x47   :  { %142 = vrot.lane.b32.xlu2 %v559_v10, %s511_s0  ;;  %140 = vrot.lane.b32.xlu1 %v561_v11, %s511_s0  ;;  %v644_v10 = vmul.f32 2.0, %v570_v14 }
  0x48   :  { %138 = vrot.lane.b32.xlu0 %v33_v6, %s511_s0 }
  0x4f   :  { %148 = vrot.lane.b32.xlu2 %v568_v13, %s511_s0  ;;  %146 = vrot.lane.b32.xlu1 %v570_v14, %s511_s0 }
  0x50   :  { %144 = vrot.lane.b32.xlu0 %v36_v9, %s511_s0 }
  0x57   :  { %152 = vrot.lane.b32.xlu1 %v577_v15, %s511_s0 }
  0x58   :  { %150 = vrot.lane.b32.xlu0 %v39_v12, %s511_s0 }
  0x61   :  { %v66_v16 = vpop.permute.xlu2 %65 }
  0x62   :  { %v110_v36 = vsel %vm105_vm0, 0.0, %v66_v16 }
  0x63   :  { %v207_v48 = vadd.f32 %v191_v33, %v110_v36 }
  0x69   :  { %v68_v17 = vpop.permute.xlu2 %67 }
  0x6a   :  { %v111_v40 = vsel %vm105_vm0, 0.0, %v68_v17 }
  0x6b   :  { %v624_v52 = vadd.f32 %v192_v37, %v111_v40 }
  0x71   :  { %v74_v18 = vpop.permute.xlu2 %73 }
  0x72   :  { %v114_v49 = vsel %vm105_vm0, 0.0, %v74_v18 }
  0x73   :  { %v632_v61 = vadd.f32 %v195_v38, %v114_v49 }
  0x79   :  { %v62_v19 = vpop.permute.xlu1 %61  ;;  %v80_v21 = vpop.permute.xlu2 %79 }
  0x7a   :  { %v58_v20 = vpop.permute.xlu0 %57  ;;  %v636_v0 = vsel %vm105_vm0, 0.0, %v80_v21  ;;  %v108_v1 = vsel %vm105_vm0, 0.0, %v62_v19 }
  0x7b   :  { %v106_v42 = vsel %vm105_vm0, 0.0, %v58_v20  ;;  %v205_v13 = vadd.f32 %v189_v44, %v108_v1 }
  0x7c   :  { %v203_v53 = vadd.f32 %v187_v39, %v106_v42 }
  0x81   :  { %v64_v22 = vpop.permute.xlu1 %63  ;;  %v593_v24 = vpop.permute.xlu2 %85 }
  0x82   :  { %v60_v23 = vpop.permute.xlu0 %59  ;;  %v109_v2 = vsel %vm105_vm0, 0.0, %v64_v22 }
  0x83   :  { %v107_v34 = vsel %vm105_vm0, 0.0, %v60_v23  ;;  %v206_v16 = vadd.f32 %v190_v46, %v109_v2 }
  0x84   :  { %v204_v47 = vadd.f32 %v188_v32, %v107_v34 }
  0x89   :  { %v72_v25 = vpop.permute.xlu1 %71  ;;  %v125_v28 = vpop.permute.xlu2 %124 }
  0x8a   :  { %v595_v26 = vpop.permute.xlu0 %69  ;;  %v172_v43 = vsel %vm170_vm1, %v125_v28, 0.0  ;;  %v113_v3 = vsel %vm105_vm0, 0.0, %v72_v25 }
  0x8b   :  { %v220_v54 = vadd.f32 %v204_v47, %v172_v43  ;;  %v210_v19 = vadd.f32 %v194_v50, %v113_v3  ;;  %v112_v23 = vsel %vm105_vm0, 0.0, %v595_v26 }
  0x8d   :  { %v253_v4 = vrot.slane %v220_v54, 7  ;;  %v302_v5 = vrot.slane %v220_v54, 1  ;;  %v350_v8 = vmul.f32 2.0, %v220_v54  ;;  %v669_v54 = vsel %vm105_vm0, 0.0, %v593_v24 }
  0x8f   :  { %v341_v22 = vsel %vm300_vm2, %v302_v5, 0.0 }
  0x91   :  { %v597_v27 = vpop.permute.xlu1 %77  ;;  %v131_v35 = vpop.permute.xlu2 %130 }
  0x92   :  { %v599_v29 = vpop.permute.xlu0 %75  ;;  %v175_v57 = vsel %vm170_vm1, %v131_v35, 0.0  ;;  %v116_v37 = vsel %vm105_vm0, 0.0, %v597_v27 }
  0x93   :  { %v641_v6 = vadd.f32 %v207_v48, %v175_v57  ;;  %v115_v38 = vsel %vm105_vm0, 0.0, %v599_v29  ;;  %v213_v57 = vadd.f32 %v197_v56, %v116_v37 }
  0x95   :  { %v258_v14 = vrot.slane %v641_v6, 7  ;;  %v353_v40 = vmul.f32 2.0, %v641_v6 }
  0x97   :  { %v294_v46 = vsel %vm251_vm3, 0.0, %v258_v14 }
  0x99   :  { %v601_v30 = vpop.permute.xlu1 %83  ;;  %v137_v9 = vpop.permute.xlu2 %136 }
  0x9a   :  { %v603_v31 = vpop.permute.xlu0 %81  ;;  %v178_v32 = vsel %vm170_vm1, %v137_v9, 0.0  ;;  %v119_v47 = vsel %vm105_vm0, 0.0, %v601_v30  ;;  %v307_v30 = vrot.slane %v641_v6, 1 }
  0x9b   :  { %v226_v48 = vadd.f32 %v210_v19, %v178_v32 }
  0x9d   :  { %v262_v9 = vrot.slane %v226_v48, 7  ;;  %v356_v19 = vmul.f32 2.0, %v226_v48 }
  0xa1   :  { %v123_v55 = vpop.permute.xlu1 %122  ;;  %v143_v1 = vpop.permute.xlu2 %142 }
  0xa2   :  { %v171_v59 = vsel %vm170_vm1, %v123_v55, 0.0  ;;  %v630_v60 = vpop.permute.xlu0 %87  ;;  %v209_v55 = vadd.f32 %v622_v51, %v112_v23 }
  0xa3   :  { %v219_v63 = vadd.f32 %v203_v53, %v171_v59 }
  0xa5   :  { %v252_v7 = vrot.slane %v219_v63, 7  ;;  %v301_v11 = vrot.slane %v219_v63, 1  ;;  %v349_v12 = vmul.f32 2.0, %v219_v63  ;;  %v212_v63 = vadd.f32 %v196_v58, %v115_v38 }
  0xa7   :  { %v254_v17 = vsel %vm251_vm3, %v252_v7, %v253_v4  ;;  %v292_v18 = vsel %vm251_vm3, 0.0, %v252_v7  ;;  %v303_v25 = vsel %vm300_vm2, %v301_v11, %v302_v5  ;;  %v369_v4 = vadd.f32 %v353_v40, %v294_v46 }
  0xa8   :  { %v365_v20 = vadd.f32 %v349_v12, %v292_v18  ;;  %v366_v21 = vadd.f32 %v350_v8, %v254_v17  ;;  %v676_v5 = vadd.f32 %v200_v62, %v119_v47  ;;  %v311_v18 = vrot.slane %v226_v48, 1 }
  0xa9   :  { %v129_v28 = vpop.permute.xlu1 %128  ;;  %v181_v62 = vsel %vm170_vm1, %v143_v1, 0.0  ;;  %v149_v47 = vpop.permute.xlu2 %148 }
  0xaa   :  { %v381_v33 = vadd.f32 %v365_v20, %v303_v25  ;;  %v382_v34 = vadd.f32 %v366_v21, %v341_v22  ;;  %v174_v35 = vsel %vm170_vm1, %v129_v28, 0.0  ;;  %v127_v36 = vpop.permute.xlu0 %126 }
  0xab   :  { %v222_v39 = vadd.f32 %v206_v16, %v174_v35  ;;  %v173_v26 = vsel %vm170_vm1, %v127_v36, 0.0  ;;  %v118_v35 = vsel %vm105_vm0, 0.0, %v603_v31  ;;  %v686_v36 = vadd.f32 %v213_v57, %v181_v62 }
  0xac   :  { %v397_v42 = vmul.f32 0.0625, %v381_v33  ;;  %v398_v43 = vmul.f32 0.0625, %v382_v34  ;;  %v221_v44 = vadd.f32 %v205_v13, %v173_v26  ;;  %v344_v31 = vsel %vm300_vm2, %v311_v18, 0.0 }
  0xad   :  { %v256_v27 = vrot.slane %v222_v39, 7  ;;  %v305_v29 = vrot.slane %v222_v39, 1  ;;  %v352_v49 = vmul.f32 2.0, %v222_v39  ;;  %v267_v57 = vrot.slane %v686_v36, 7 }
  0xae   :  { %414 = vst.msk [vmem:[#allocation5] sm:$0xff] %vm413_vm4, %v397_v42  ;;  %v255_v50 = vrot.slane %v221_v44, 7  ;;  %v304_v53 = vrot.slane %v221_v44, 1  ;;  %v351_v59 = vmul.f32 2.0, %v221_v44 }
  0xaf   :  { %415 = vst.msk [vmem:[#allocation5 + $0x8] sm:$0xff] %vm413_vm4, %v398_v43  ;;  %v342_v51 = vsel %vm300_vm2, %v305_v29, 0.0 }
  0xb0   :  { %v257_v2 = vsel %vm251_vm3, %v255_v50, %v256_v27  ;;  %v293_v3 = vsel %vm251_vm3, 0.0, %v255_v50  ;;  %v306_v56 = vsel %vm300_vm2, %v304_v53, %v305_v29 }
  0xb1   :  { %v367_v7 = vadd.f32 %v351_v59, %v293_v3  ;;  %v368_v24 = vadd.f32 %v352_v49, %v257_v2  ;;  %v135_v8 = vpop.permute.xlu1 %134  ;;  %v184_v2 = vsel %vm170_vm1, %v149_v47, 0.0 }
  0xb2   :  { %v177_v11 = vsel %vm170_vm1, %v135_v8, 0.0  ;;  %v133_v12 = vpop.permute.xlu0 %132 }
  0xb3   :  { %v383_v58 = vadd.f32 %v367_v7, %v306_v56  ;;  %v384_v13 = vadd.f32 %v368_v24, %v342_v51  ;;  %v225_v16 = vadd.f32 %v209_v55, %v177_v11  ;;  %v176_v17 = vsel %vm170_vm1, %v133_v12, 0.0 }
  0xb4   :  { %v224_v20 = vadd.f32 %v624_v52, %v176_v17  ;;  %v214_v51 = vadd.f32 %v611_v41, %v636_v0  ;;  %v217_v56 = vadd.f32 %v616_v45, %v669_v54  ;;  %v202_v11 = vmul.f32 2.0, %v577_v15 }
  0xb5   :  { %v399_v21 = vmul.f32 0.0625, %v383_v58  ;;  %v400_v22 = vmul.f32 0.0625, %v384_v13  ;;  %v261_v23 = vrot.slane %v225_v16, 7  ;;  %v310_v25 = vrot.slane %v225_v16, 1 }
  0xb6   :  { %v355_v28 = vmul.f32 2.0, %v225_v16  ;;  %v259_v32 = vrot.slane %v224_v20, 7  ;;  %v308_v33 = vrot.slane %v224_v20, 1  ;;  %v354_v34 = vmul.f32 2.0, %v224_v20 }
  0xb7   :  { %416 = vst.msk [vmem:[#allocation5 + $0x10] sm:$0xff] %vm413_vm4, %v399_v21  ;;  %v263_v37 = vsel %vm251_vm3, %v261_v23, %v262_v9  ;;  %v295_v38 = vsel %vm251_vm3, 0.0, %v261_v23  ;;  %v312_v42 = vsel %vm300_vm2, %v310_v25, %v311_v18  ;;  %v121_v12 = vsel %vm105_vm0, 0.0, %v630_v60 }
  0xb8   :  { %417 = vst.msk [vmem:[#allocation5 + $0x18] sm:$0xff] %vm413_vm4, %v400_v22  ;;  %v371_v52 = vadd.f32 %v355_v28, %v295_v38  ;;  %v372_v39 = vadd.f32 %v356_v19, %v263_v37  ;;  %v260_v26 = vsel %vm251_vm3, %v258_v14, %v259_v32  ;;  %v309_v40 = vsel %vm300_vm2, %v307_v30, %v308_v33 }
  0xb9   :  { %v370_v43 = vadd.f32 %v354_v34, %v260_v26  ;;  %v385_v44 = vadd.f32 %v369_v4, %v309_v40  ;;  %v141_v46 = vpop.permute.xlu1 %140  ;;  %v343_v29 = vsel %vm300_vm2, %v308_v33, 0.0  ;;  %v232_v58 = vadd.f32 %v676_v5, %v184_v2 }
  0xba   :  { %v387_v48 = vadd.f32 %v371_v52, %v312_v42  ;;  %v388_v27 = vadd.f32 %v372_v39, %v344_v31  ;;  %v180_v49 = vsel %vm170_vm1, %v141_v46, 0.0  ;;  %v139_v50 = vpop.permute.xlu0 %138  ;;  %v316_v0 = vrot.slane %v686_v36, 1 }
  0xbb   :  { %v386_v6 = vadd.f32 %v370_v43, %v343_v29  ;;  %v401_v53 = vmul.f32 0.0625, %v385_v44  ;;  %v228_v14 = vadd.f32 %v212_v63, %v180_v49  ;;  %v179_v55 = vsel %vm170_vm1, %v139_v50, 0.0 }
  0xbc   :  { %v403_v59 = vmul.f32 0.0625, %v387_v48  ;;  %v404_v30 = vmul.f32 0.0625, %v388_v27  ;;  %v227_v1 = vadd.f32 %v632_v61, %v179_v55  ;;  %v215_v61 = vadd.f32 %v644_v10, %v118_v35 }
  0xbd   :  { %v402_v3 = vmul.f32 0.0625, %v386_v6  ;;  %418 = vst.msk [vmem:[#allocation5 + $0x20] sm:$0xff] %vm413_vm4, %v401_v53  ;;  %v265_v4 = vrot.slane %v228_v14, 7  ;;  %v358_v7 = vmul.f32 2.0, %v228_v14  ;;  %v314_v24 = vrot.slane %v228_v14, 1 }
  0xbe   :  { %420 = vst.msk [vmem:[#allocation5 + $0x30] sm:$0xff] %vm413_vm4, %v403_v59  ;;  %v264_v8 = vrot.slane %v227_v1, 7  ;;  %v313_v63 = vrot.slane %v227_v1, 1  ;;  %v357_v9 = vmul.f32 2.0, %v227_v1  ;;  %v359_v45 = vmul.f32 2.0, %v686_v36 }
  0xbf   :  { %421 = vst.msk [vmem:[#allocation5 + $0x38] sm:$0xff] %vm413_vm4, %v404_v30  ;;  %v297_v16 = vsel %vm251_vm3, 0.0, %v267_v57  ;;  %v345_v17 = vsel %vm300_vm2, %v314_v24, 0.0  ;;  %v271_v22 = vrot.slane %v232_v58, 7  ;;  %v320_v23 = vrot.slane %v232_v58, 1 }
  0xc0   :  { %419 = vst.msk [vmem:[#allocation5 + $0x28] sm:$0xff] %vm413_vm4, %v402_v3  ;;  %v266_v13 = vsel %vm251_vm3, %v264_v8, %v265_v4  ;;  %v296_v41 = vsel %vm251_vm3, 0.0, %v264_v8  ;;  %v315_v60 = vsel %vm300_vm2, %v313_v63, %v314_v24  ;;  %v362_v25 = vmul.f32 2.0, %v232_v58 }
  0xc1   :  { %v373_v10 = vadd.f32 %v357_v9, %v296_v41  ;;  %v374_v54 = vadd.f32 %v358_v7, %v266_v13  ;;  %v147_v15 = vpop.permute.xlu1 %146  ;;  %v375_v39 = vadd.f32 %v359_v45, %v297_v16  ;;  %v218_v26 = vadd.f32 %v202_v11, %v121_v12 }
  0xc2   :  { %v183_v5 = vsel %vm170_vm1, %v147_v15, 0.0  ;;  %v145_v18 = vpop.permute.xlu0 %144  ;;  %v347_v47 = vsel %vm300_vm2, %v320_v23, 0.0 }
  0xc3   :  { %v389_v19 = vadd.f32 %v373_v10, %v315_v60  ;;  %v390_v62 = vadd.f32 %v374_v54, %v345_v17  ;;  %v231_v20 = vadd.f32 %v215_v61, %v183_v5  ;;  %v182_v21 = vsel %vm170_vm1, %v145_v18, 0.0 }
  0xc4   :  { %v230_v28 = vadd.f32 %v214_v51, %v182_v21 }
  0xc5   :  { %v405_v32 = vmul.f32 0.0625, %v389_v19  ;;  %v406_v33 = vmul.f32 0.0625, %v390_v62  ;;  %v270_v34 = vrot.slane %v231_v20, 7  ;;  %v319_v35 = vrot.slane %v231_v20, 1 }
  0xc6   :  { %v361_v36 = vmul.f32 2.0, %v231_v20  ;;  %v268_v37 = vrot.slane %v230_v28, 7  ;;  %v317_v38 = vrot.slane %v230_v28, 1  ;;  %v360_v52 = vmul.f32 2.0, %v230_v28 }
  0xc7   :  { %422 = vst.msk [vmem:[#allocation5 + $0x40] sm:$0xff] %vm413_vm4, %v405_v32  ;;  %v272_v40 = vsel %vm251_vm3, %v270_v34, %v271_v22  ;;  %v298_v31 = vsel %vm251_vm3, 0.0, %v270_v34  ;;  %v321_v48 = vsel %vm300_vm2, %v319_v35, %v320_v23 }
  0xc8   :  { %423 = vst.msk [vmem:[#allocation5 + $0x48] sm:$0xff] %vm413_vm4, %v406_v33  ;;  %v377_v42 = vadd.f32 %v361_v36, %v298_v31  ;;  %v378_v43 = vadd.f32 %v362_v25, %v272_v40  ;;  %v269_v44 = vsel %vm251_vm3, %v267_v57, %v268_v37  ;;  %v318_v46 = vsel %vm300_vm2, %v316_v0, %v317_v38 }
  0xc9   :  { %v376_v27 = vadd.f32 %v360_v52, %v269_v44  ;;  %v391_v29 = vadd.f32 %v375_v39, %v318_v46  ;;  %v153_v49 = vpop.permute.xlu1 %152  ;;  %v346_v53 = vsel %vm300_vm2, %v317_v38, 0.0 }
  0xca   :  { %v393_v50 = vadd.f32 %v377_v42, %v321_v48  ;;  %v394_v6 = vadd.f32 %v378_v43, %v347_v47  ;;  %v186_v14 = vsel %vm170_vm1, %v153_v49, 0.0  ;;  %v151_v55 = vpop.permute.xlu0 %150 }
  0xcb   :  { %v392_v59 = vadd.f32 %v376_v27, %v346_v53  ;;  %v407_v30 = vmul.f32 0.0625, %v391_v29  ;;  %v234_v1 = vadd.f32 %v218_v26, %v186_v14  ;;  %v185_v57 = vsel %vm170_vm1, %v151_v55, 0.0 }
  0xcc   :  { %v409_v2 = vmul.f32 0.0625, %v393_v50  ;;  %v410_v3 = vmul.f32 0.0625, %v394_v6  ;;  %v233_v4 = vadd.f32 %v217_v56, %v185_v57 }
  0xcd   :  { %v408_v7 = vmul.f32 0.0625, %v392_v59  ;;  %424 = vst.msk [vmem:[#allocation5 + $0x50] sm:$0xff] %vm413_vm4, %v407_v30  ;;  %v274_v24 = vrot.slane %v234_v1, 7  ;;  %v364_v8 = vmul.f32 2.0, %v234_v1  ;;  %v323_v63 = vrot.slane %v234_v1, 1 }
  0xce   :  { %426 = vst.msk [vmem:[#allocation5 + $0x60] sm:$0xff] %vm413_vm4, %v409_v2  ;;  %v273_v9 = vrot.slane %v233_v4, 7  ;;  %v322_v51 = vrot.slane %v233_v4, 1  ;;  %v363_v61 = vmul.f32 2.0, %v233_v4 }
  0xcf   :  { %427 = vst.msk [vmem:[#allocation5 + $0x68] sm:$0xff] %vm413_vm4, %v410_v3  ;;  %v348_v13 = vsel %vm300_vm2, %v323_v63, 0.0 }
  0xd0   :  { %425 = vst.msk [vmem:[#allocation5 + $0x58] sm:$0xff] %vm413_vm4, %v408_v7  ;;  %v275_v11 = vsel %vm251_vm3, %v273_v9, %v274_v24  ;;  %v299_v12 = vsel %vm251_vm3, 0.0, %v273_v9  ;;  %v324_v41 = vsel %vm300_vm2, %v322_v51, %v323_v63 }
  0xd1   :  { %v379_v56 = vadd.f32 %v363_v61, %v299_v12  ;;  %v380_v58 = vadd.f32 %v364_v8, %v275_v11 }
  0xd3   :  { %v395_v0 = vadd.f32 %v379_v56, %v324_v41  ;;  %v396_v45 = vadd.f32 %v380_v58, %v348_v13 }
  0xd5   :  { %v411_v10 = vmul.f32 0.0625, %v395_v0  ;;  %v412_v54 = vmul.f32 0.0625, %v396_v45 }
  0xd7   :  { %428 = vst.msk [vmem:[#allocation5 + $0x70] sm:$0xff] %vm413_vm4, %v411_v10 }
  0xd8   :  { %429 = vst.msk [vmem:[#allocation5 + $0x78] sm:$0xff] %vm413_vm4, %v412_v54 }
  0xd9   :  { %442 = dma.vmem_to_hbm [thread:$0]  %s435_s15, 2048, %s437_s18, [#allocation4], %s508_s11, %s508_s11, %s509_s12  }
  0xda   :  { %505 = dma.done.wait [#allocation4], 2048  }
  0xdb   :  { %506 = vsyncadd [#allocation4], 4294965248 }
  0xdc   :  { %447 = vsyncpa [#allocation3], 1 }
  0xdd   :  { %448 = vsyncpa [#allocation4], 1 }

</bundles_post_ra>
